<compile_context>
chip_gen: v7x
topology: tpu7x:2x2x1
jax: 0.10.0
libtpu: 0.0.40
codegen_flags: <defaults>
</compile_context>

<pallas_src>
import functools

import jax
import jax.numpy as jnp
from jax.experimental import pallas as pl
from jax.experimental.pallas import tpu as pltpu


def _round_up(v: int, m: int) -> int:
    return ((v + m - 1) // m) * m


def _pool_kernel(ids_ref, x_ref, o_ref, *, num_nodes, tiles_per_split):
    # ids_ref: (1, TILE_N)        int32  graph id per node (padded tail = out-of-range id)
    # x_ref:   (TILE_N, F_in)     f32    node-feature tile (rows past num_nodes undefined)
    # o_ref:   (1, B_p, F_in)     f32    per-split per-graph feature sums (revisited over t)
    c = pl.program_id(0)          # core split (parallel)
    t = pl.program_id(1)          # node-tile within split (arbitrary / reduction)
    tile_n = x_ref.shape[0]
    b_p = o_ref.shape[1]

    @pl.when(t == 0)
    def _init():
        o_ref[...] = jnp.zeros_like(o_ref)

    # Branch-free validity mask for the ragged last tile / duplicated clamped tile.
    # Guards against undefined (possibly NaN) rows beyond num_nodes.
    start = (c * tiles_per_split + t) * tile_n
    row = jax.lax.broadcasted_iota(jnp.int32, (tile_n, 1), 0)
    x_tile = jnp.where(row + start < num_nodes, x_ref[...], 0.0)

    # One-hot segment mask; padded/out-of-range ids match no graph row.
    ids = ids_ref[...]                                                  # (1, TILE_N)
    giota = jax.lax.broadcasted_iota(jnp.int32, (b_p, tile_n), 0)       # (B_p, TILE_N)
    onehot = (giota == ids).astype(jnp.float32)

    # Per-graph feature sum: (B_p, TILE_N) @ (TILE_N, F_in) -> (B_p, F_in), f32 MXU.
    o_ref[0] += jnp.dot(onehot, x_tile, preferred_element_type=jnp.float32)


def _epilogue_kernel(part_ref, inv_ref, w1_ref, b1_ref, w2_ref, o_ref):
    # part_ref: (S, B_p, F_in) f32   per-split partial feature sums
    # inv_ref:  (B_p, 1)       f32   1 / max(count, 1)
    # w1_ref:   (F_in, F_out_p) f32  XtoGlobal linear (transposed, zero-padded)
    # b1_ref:   (1, F_out_p)    f32
    # w2_ref:   (F_out_p, F_out_p) f32  self.lin (no bias, transposed, zero-padded)
    # o_ref:    (B_p, F_out_p)  f32
    pooled = part_ref[0]
    for s in range(1, part_ref.shape[0]):     # unrolled; S is tiny (2)
        pooled = pooled + part_ref[s]
    pooled = pooled * inv_ref[...]            # mean pooling via precomputed reciprocals

    g = jnp.dot(pooled, w1_ref[...], preferred_element_type=jnp.float32) + b1_ref[...]
    o_ref[...] = (g + jnp.dot(jnp.maximum(g, 0.0), w2_ref[...],
                              preferred_element_type=jnp.float32)).astype(o_ref.dtype)


@functools.partial(jax.jit, static_argnames=("num_graphs", "tile_n", "num_splits"))
def feature_extractor(x, batch, params, num_graphs, *, tile_n=4096, num_splits=2):
    """x: (num_nodes, in_features) f32, batch: (num_nodes,) int graph ids."""
    num_nodes, in_features = x.shape
    in_features_w, out_features = params["w1"].shape
    assert in_features_w == in_features
    num_splits = max(int(num_splits), 1)

    x = x.astype(jnp.float32)
    batch = batch.astype(jnp.int32)

    f_out_p = _round_up(out_features, 128)
    b_p = _round_up(max(num_graphs, 1), 8)
    lane_f_in = _round_up(in_features, 128)          # VMEM layout width of an x block

    # --- generation-aware VMEM budget ------------------------------------
    try:
        vmem_cap = int(pltpu.get_tpu_info().vmem_capacity_bytes)
    except Exception:
        vmem_cap = 64 << 20                           # v7x-safe fallback

    # --- node tile size ----------------------------------------------------
    # Per-node VMEM footprint of one streamed buffer (x block is lane-padded in VMEM
    # layout; ids block is sublane-padded). HBM traffic itself is unpadded.
    row_vmem = lane_f_in * 4 + 8 * 4
    stream_budget = max(8 << 20, min(vmem_cap - (16 << 20), 96 << 20))
    max_rows = max(128, stream_budget // (2 * row_vmem))          # 2 = double buffering

    tile_n = max(128, (int(tile_n) // 128) * 128)                 # multiple of 128
    tile_n = min(tile_n, max(128, (max_rows // 128) * 128))
    per_split = pl.cdiv(max(num_nodes, 1), num_splits)
    tile_n = min(tile_n, _round_up(per_split, 128))               # don't over-tile tiny inputs

    n_tiles_x = pl.cdiv(max(num_nodes, 1), tile_n)
    tiles_per_split = pl.cdiv(n_tiles_x, num_splits)
    x_last_block = n_tiles_x - 1
    n_ids_pad = num_splits * tiles_per_split * tile_n

    # --- tiny host-side prep (no copies of x!) -----------------------------
    # Padded id slots get an out-of-range graph id so they match no graph.
    ids_p = jnp.full((1, n_ids_pad), b_p, dtype=jnp.int32).at[0, :num_nodes].set(batch)

    counts = jnp.zeros((num_graphs,), jnp.float32).at[batch].add(1.0)
    inv = 1.0 / jnp.maximum(counts, 1.0)
    inv_p = jnp.zeros((b_p, 1), jnp.float32).at[:num_graphs, 0].set(inv)

    w1_p = jnp.zeros((in_features, f_out_p), jnp.float32).at[:, :out_features].set(params["w1"])
    b1_p = jnp.zeros((1, f_out_p), jnp.float32).at[0, :out_features].set(params["b1"])
    w2_p = jnp.zeros((f_out_p, f_out_p), jnp.float32).at[
        :out_features, :out_features].set(params["w2"])

    est = 2 * tile_n * row_vmem + 4 * b_p * lane_f_in * 4 + (2 << 20)
    vmem_limit = int(min(vmem_cap - (16 << 20), max(2 * est, 32 << 20)))
    vmem_limit = int(max(vmem_limit, est + (4 << 20)))

    # --- kernel 1: HBM-bound per-graph feature sums, split across TensorCores ---
    partials = pl.pallas_call(
        functools.partial(_pool_kernel, num_nodes=num_nodes,
                          tiles_per_split=tiles_per_split),
        out_shape=jax.ShapeDtypeStruct((num_splits, b_p, in_features), jnp.float32),
        grid=(num_splits, tiles_per_split),
        in_specs=[
            # batch ids: one (1, tile_n) block per step (tiny; amortised by large tile_n)
            pl.BlockSpec((1, tile_n), lambda c, t: (0, c * tiles_per_split + t)),
            # x: streamed unpadded; index clamped so over-provisioned tiles stay in bounds
            # (their contribution is masked to zero in-kernel).
            pl.BlockSpec((tile_n, in_features),
                         lambda c, t: (jnp.minimum(c * tiles_per_split + t,
                                                   x_last_block), 0)),
        ],
        out_specs=pl.BlockSpec((1, b_p, in_features), lambda c, t: (c, 0, 0)),
        compiler_params=pltpu.CompilerParams(
            dimension_semantics=("parallel", "arbitrary"),
            vmem_limit_bytes=vmem_limit),
    )(ids_p, x)

    # --- kernel 2: tiny epilogue (combine partials, mean, linears, relu, residual) ---
    out_p = pl.pallas_call(
        _epilogue_kernel,
        out_shape=jax.ShapeDtypeStruct((b_p, f_out_p), jnp.float32),
    )(partials, inv_p, w1_p, b1_p, w2_p)

    return out_p[:num_graphs, :out_features]


def init_params(key, in_features, out_features):
    k1, k2, k3 = jax.random.split(key, 3)
    lim1 = 1.0 / jnp.sqrt(in_features)
    lim2 = 1.0 / jnp.sqrt(out_features)
    return {
        # stored (in, out) so kernel does x @ W; equals PyTorch weight.T
        "w1": jax.random.uniform(k1, (in_features, out_features),
                                 jnp.float32, -lim1, lim1),
        "b1": jax.random.uniform(k2, (out_features,), jnp.float32, -lim1, lim1),
        "w2": jax.random.uniform(k3, (out_features, out_features),
                                 jnp.float32, -lim2, lim2),
    }


def feature_extractor_ref(x, batch, params, num_graphs):
    """Pure-JAX f32 reference for sanity checking."""
    mask = (jnp.arange(num_graphs)[:, None] == batch[None, :]).astype(jnp.float32)
    counts = jnp.maximum(mask.sum(axis=1, keepdims=True), 1.0)
    pooled = (mask @ x) / counts
    g = pooled @ params["w1"] + params["b1"][None, :]
    return g + jnp.maximum(g, 0.0) @ params["w2"]


if __name__ == "__main__":
    key = jax.random.PRNGKey(0)
    kx, kp = jax.random.split(key)

    num_nodes = 370          # not a multiple of the tile -> exercises the ragged-tail mask
    in_features = 16
    out_features = 32
    num_graphs = 4

    x = jax.random.normal(kx, (num_nodes, in_features), jnp.float32)
    # deterministic, slightly uneven graph assignment (contiguous blocks)
    batch = jnp.minimum(jnp.arange(num_nodes, dtype=jnp.int32) // 100,
                        num_graphs - 1)

    params = init_params(kp, in_features, out_features)

    # tile_n=128 -> grid=(2, 2): exercises the parallel split, the accumulated reduction,
    # the ragged last tile and the clamped over-provisioned tile.
    out = feature_extractor(x, batch, params, num_graphs, tile_n=128)
    out = jax.block_until_ready(out)

    ref = feature_extractor_ref(x, batch, params, num_graphs)
    assert out.shape == (num_graphs, out_features)
    # Full f32 streaming + f32 accumulation -> tight tolerance vs the f32 reference.
    assert jnp.allclose(out, ref, atol=1e-4, rtol=1e-4), float(
        jnp.max(jnp.abs(out - ref)))

    print("KERNEL_OK")
</pallas_src>

<mosaic_0001>
module attributes {stable_mosaic.version = 11 : i64} {
  func.func @_pool_kernel(%arg0: i32, %arg1: i32, %arg2: memref<1x128xi32, #tpu.memory_space<vmem>>, %arg3: memref<128x16xf32, #tpu.memory_space<vmem>>, %arg4: memref<1x8x16xf32, #tpu.memory_space<vmem>>) attributes {dimension_semantics = [#tpu.dimension_semantics<parallel>, #tpu.dimension_semantics<arbitrary>], iteration_bounds = array<i64: 2, 2>, scalar_prefetch = 0 : i64, scratch_operands = 0 : i64, tpu.core_type = #tpu.core_type<tc>, window_params = [{transform_indices = @transform_0, window_bounds = array<i64: 1, 128>}, {transform_indices = @transform_1, window_bounds = array<i64: 128, 16>}, {transform_indices = @transform_2, window_bounds = array<i64: 1, 8, 16>}]} {
    %c0_i32 = arith.constant 0 : i32
    %0 = arith.cmpi eq, %arg1, %c0_i32 : i32
    %1 = arith.extui %0 : i1 to i32
    %c0_i32_0 = arith.constant 0 : i32
    %2 = arith.cmpi ne, %1, %c0_i32_0 : i32
    scf.if %2 {
      %cst_11 = arith.constant 0.000000e+00 : f32
      %29 = vector.broadcast %cst_11 : f32 to vector<1x8x16xf32>
      %c0_12 = arith.constant 0 : index
      %c0_13 = arith.constant 0 : index
      %c0_14 = arith.constant 0 : index
      %30 = vector.load %arg4[%c0_12, %c0_13, %c0_14] : memref<1x8x16xf32, #tpu.memory_space<vmem>>, vector<1x8x16xf32>
      tpu.vector_store %arg4[%c0_12, %c0_13, %c0_14], %29 {strides = array<i32>} : memref<1x8x16xf32, #tpu.memory_space<vmem>>, vector<1x8x16xf32>,
    } else {
    }
    %c2_i32 = arith.constant 2 : i32
    %3 = arith.muli %arg0, %c2_i32 : i32
    %4 = arith.addi %3, %arg1 : i32
    %c128_i32 = arith.constant 128 : i32
    %5 = arith.muli %4, %c128_i32 : i32
    %6 = tpu.iota {dimensions = array<i32: 0>} : vector<128x1xi32>
    %7 = vector.broadcast %5 : i32 to vector<128x1xi32>
    %8 = arith.addi %6, %7 : vector<128x1xi32>
    %c370_i32 = arith.constant 370 : i32
    %9 = vector.broadcast %c370_i32 : i32 to vector<128x1xi32>
    %10 = arith.cmpi slt, %8, %9 : vector<128x1xi32>
    %c0 = arith.constant 0 : index
    %c0_1 = arith.constant 0 : index
    %11 = vector.load %arg3[%c0, %c0_1] : memref<128x16xf32, #tpu.memory_space<vmem>>, vector<128x16xf32>
    %cst = arith.constant 0.000000e+00 : f32
    %12 = vector.shape_cast %10 : vector<128x1xi1> to vector<128x1xi1>
    %13 = vector.broadcast %12 : vector<128x1xi1> to vector<128x16xi1>
    %14 = vector.broadcast %cst : f32 to vector<128x16xf32>
    %15 = arith.select %13, %11, %14 : vector<128x16xi1>, vector<128x16xf32>
    %c0_2 = arith.constant 0 : index
    %c0_3 = arith.constant 0 : index
    %16 = vector.load %arg2[%c0_2, %c0_3] : memref<1x128xi32, #tpu.memory_space<vmem>>, vector<1x128xi32>
    %17 = tpu.iota {dimensions = array<i32: 0>} : vector<8x128xi32>
    %18 = vector.broadcast %16 : vector<1x128xi32> to vector<8x128xi32>
    %19 = arith.cmpi eq, %17, %18 : vector<8x128xi32>
    %20 = arith.extui %19 : vector<8x128xi1> to vector<8x128xi32>
    %21 = arith.sitofp %20 : vector<8x128xi32> to vector<8x128xf32>
    %c0_4 = arith.constant 0 : index
    %c0_5 = arith.constant 0 : index
    %c0_6 = arith.constant 0 : index
    %22 = vector.load %arg4[%c0_4, %c0_5, %c0_6] : memref<1x8x16xf32, #tpu.memory_space<vmem>>, vector<1x8x16xf32>
    %23 = vector.shape_cast %22 : vector<1x8x16xf32> to vector<8x16xf32>
    %cst_7 = arith.constant dense<0.000000e+00> : vector<8x16xf32>
    %24 = tpu.matmul %21, %15, %cst_7 {dimension_numbers = #tpu.dot_dimension_numbers<[1], [0], [0], [1], [0, 0, 1, 1], [], []>} : vector<8x128xf32>, vector<128x16xf32>, vector<8x16xf32> -> vector<8x16xf32>
    %25 = arith.addf %23, %24 : vector<8x16xf32>
    %c0_8 = arith.constant 0 : index
    %c0_9 = arith.constant 0 : index
    %c0_10 = arith.constant 0 : index
    %26 = vector.load %arg4[%c0_8, %c0_9, %c0_10] : memref<1x8x16xf32, #tpu.memory_space<vmem>>, vector<1x8x16xf32>
    %27 = vector.shape_cast %26 : vector<1x8x16xf32> to vector<8x16xf32>
    %28 = vector.shape_cast %25 : vector<8x16xf32> to vector<1x8x16xf32>
    tpu.vector_store %arg4[%c0_8, %c0_9, %c0_10], %28 {strides = array<i32>} : memref<1x8x16xf32, #tpu.memory_space<vmem>>, vector<1x8x16xf32>,
    return
  }
  func.func @transform_0(%arg0: i32, %arg1: i32) -> (i32, i32) {
    %c2_i32 = arith.constant 2 : i32
    %0 = arith.muli %arg0, %c2_i32 : i32
    %1 = arith.addi %0, %arg1 : i32
    %c0_i32 = arith.constant 0 : i32
    %c0_i32_0 = arith.constant 0 : i32
    return %c0_i32, %1 : i32, i32
  }
  func.func @transform_1(%arg0: i32, %arg1: i32) -> (i32, i32) {
    %c2_i32 = arith.constant 2 : i32
    %0 = arith.muli %arg0, %c2_i32 : i32
    %1 = arith.addi %0, %arg1 : i32
    %c2_i32_0 = arith.constant 2 : i32
    %2 = arith.minsi %1, %c2_i32_0 : i32
    %c0_i32 = arith.constant 0 : i32
    %c0_i32_1 = arith.constant 0 : i32
    return %2, %c0_i32 : i32, i32
  }
  func.func @transform_2(%arg0: i32, %arg1: i32) -> (i32, i32, i32) {
    %c0_i32 = arith.constant 0 : i32
    %c0_i32_0 = arith.constant 0 : i32
    %c0_i32_1 = arith.constant 0 : i32
    return %arg0, %c0_i32, %c0_i32_0 : i32, i32, i32
  }
}

module attributes {stable_mosaic.version = 11 : i64} {
  func.func @_epilogue_kernel(%arg0: memref<2x8x16xf32, #tpu.memory_space<vmem>>, %arg1: memref<8x1xf32, #tpu.memory_space<vmem>>, %arg2: memref<16x128xf32, #tpu.memory_space<vmem>>, %arg3: memref<1x128xf32, #tpu.memory_space<vmem>>, %arg4: memref<128x128xf32, #tpu.memory_space<vmem>>, %arg5: memref<8x128xf32, #tpu.memory_space<vmem>>) attributes {dimension_semantics = [], scalar_prefetch = 0 : i64, scratch_operands = 0 : i64, tpu.core_type = #tpu.core_type<tc>} {
    %c0 = arith.constant 0 : index
    %c0_0 = arith.constant 0 : index
    %c0_1 = arith.constant 0 : index
    %0 = vector.load %arg0[%c0, %c0_0, %c0_1] : memref<2x8x16xf32, #tpu.memory_space<vmem>>, vector<1x8x16xf32>
    %1 = vector.shape_cast %0 : vector<1x8x16xf32> to vector<8x16xf32>
    %c1 = arith.constant 1 : index
    %c0_2 = arith.constant 0 : index
    %c0_3 = arith.constant 0 : index
    %2 = vector.load %arg0[%c1, %c0_2, %c0_3] : memref<2x8x16xf32, #tpu.memory_space<vmem>>, vector<1x8x16xf32>
    %3 = vector.shape_cast %2 : vector<1x8x16xf32> to vector<8x16xf32>
    %4 = arith.addf %1, %3 : vector<8x16xf32>
    %c0_4 = arith.constant 0 : index
    %c0_5 = arith.constant 0 : index
    %5 = vector.load %arg1[%c0_4, %c0_5] : memref<8x1xf32, #tpu.memory_space<vmem>>, vector<8x1xf32>
    %6 = vector.broadcast %5 : vector<8x1xf32> to vector<8x16xf32>
    %7 = arith.mulf %4, %6 : vector<8x16xf32>
    %c0_6 = arith.constant 0 : index
    %c0_7 = arith.constant 0 : index
    %8 = vector.load %arg2[%c0_6, %c0_7] : memref<16x128xf32, #tpu.memory_space<vmem>>, vector<16x128xf32>
    %cst = arith.constant dense<0.000000e+00> : vector<8x128xf32>
    %9 = tpu.matmul %7, %8, %cst {dimension_numbers = #tpu.dot_dimension_numbers<[1], [0], [0], [1], [0, 0, 1, 1], [], []>} : vector<8x16xf32>, vector<16x128xf32>, vector<8x128xf32> -> vector<8x128xf32>
    %c0_8 = arith.constant 0 : index
    %c0_9 = arith.constant 0 : index
    %10 = vector.load %arg3[%c0_8, %c0_9] : memref<1x128xf32, #tpu.memory_space<vmem>>, vector<1x128xf32>
    %11 = vector.broadcast %10 : vector<1x128xf32> to vector<8x128xf32>
    %12 = arith.addf %9, %11 : vector<8x128xf32>
    %cst_10 = arith.constant 0.000000e+00 : f32
    %13 = vector.broadcast %cst_10 : f32 to vector<8x128xf32>
    %14 = arith.maximumf %12, %13 : vector<8x128xf32>
    %c0_11 = arith.constant 0 : index
    %c0_12 = arith.constant 0 : index
    %15 = vector.load %arg4[%c0_11, %c0_12] : memref<128x128xf32, #tpu.memory_space<vmem>>, vector<128x128xf32>
    %cst_13 = arith.constant dense<0.000000e+00> : vector<8x128xf32>
    %16 = tpu.matmul %14, %15, %cst_13 {dimension_numbers = #tpu.dot_dimension_numbers<[1], [0], [0], [1], [0, 0, 1, 1], [], []>} : vector<8x128xf32>, vector<128x128xf32>, vector<8x128xf32> -> vector<8x128xf32>
    %17 = arith.addf %12, %16 : vector<8x128xf32>
    %c0_14 = arith.constant 0 : index
    %c0_15 = arith.constant 0 : index
    %18 = vector.load %arg5[%c0_14, %c0_15] : memref<8x128xf32, #tpu.memory_space<vmem>>, vector<8x128xf32>
    tpu.vector_store %arg5[%c0_14, %c0_15], %17 {strides = array<i32>} : memref<8x128xf32, #tpu.memory_space<vmem>>, vector<8x128xf32>,
    return
  }
}

</mosaic_0001>

<bundles_post_ra>
// kernel: feature_extractor.2
= control target key start
LH: loop header
LB: loop body
LE: loop exit
PB: predicated region body
PF: predicated region fallthrough
CT: control target
= control target key end

     0   :  { %s737_s9 = smov 0   ;;  %s739_s10 = smov 0   ;;  %s871_s0 = inlined_call_operand.vmem [shape: s32[1,512], index: 0, kind: input, shape index: {}]   ;;  %s872_s1 = inlined_call_operand.vmem [shape: f32[370,16], index: 1, kind: input, shape index: {}]   ;;  %s873_s2 = inlined_call_operand.vmem [shape: f32[2,8,16], index: 2, kind: output, shape index: {}]  }
   0x1   :  { %s741_s11 = smov 0   ;;  %s743_s12 = smov 0  }
   0x2   :  { %s745_s13 = smov 0  }
   0x3 LB: > { %s21_s14 = sadd.s32 1, %s707_s11  ;;  %s24_s15 = sadd.s32 1, %s711_s12  ;;  %s715_s13 = sphi %s745_s13, %s12_s13   ;;  %s711_s12 = sphi %s743_s12, %s877_s12   ;;  %s707_s11 = sphi %s741_s11, %s876_s11   ;;  %s703_s10 = sphi %s739_s10, %s875_s10   ;;  %s699_s9 = sphi %s737_s9, %s874_s9  }
   0x4   : > { %p22_p0 = scmp.ge.s32.totalorder %s21_s14, 2  ;;  %p518_p1 = scmp.ge.s32.totalorder %s715_s13, 1 }
   0x5   : > { %p165_p2 = scmp.lt.s32.totalorder %s715_s13, 5 }
   0x6   : > { %s879_s14 = smov (%p22_p0, %s21_s14), 0  ;;  %s881_s15 = smov (!%p22_p0, %s24_s15), %s711_s12 }
   0x7   : > { %p166_p3 = pnand %p518_p1, %p165_p2  ;;  %p26_p4 = scmp.ge.s32.totalorder %s881_s15, 2 }
   0x8   : > { %s519_s16 = sshll.u32 (!%p166_p3), %s703_s10, 1  ;;  %p228_p5 = scmp.lt.s32.totalorder (!%p166_p3), %s703_s10, 1 }
   0x9   : > { %s883_s15 = smov (%p26_p4, %s881_s15), 0  ;;  %169 = sbr.rel (%p166_p3) target bundleno = 284 (0x11c), region = 28 }
   0xa   : > { %s200_s17 = sadd.s32 (!%p166_p3), %s699_s9, %s519_s16  ;;  %p524_p9 = scmp.ne.s32.totalorder (!%p166_p3), %s699_s9, 0 }
   0xb   : > { %p201_p6 = scmp.lt.s32.totalorder (!%p166_p3), %s200_s17, 3  ;;  %p208_p7 = scmp.lt.s32.totalorder (!%p166_p3), %s200_s17, 2 }
  0x10   : > { %s885_s10 = smov (!%p228_p5, %s703_s10), 1  ;;  %vm236_vm0 = vcmask (!%p524_p9), 130048   ;;  %v717_v0 = vmov (!%p524_p9), 0.0  }
  0x11   : > { %s770_s18 = scalar_select %p201_p6, %s200_s17, 3 }
  0x12   : > { %s209_s19 = scalar_select %p208_p7, %s200_s17, 2 }
  0x13   : > { %s203_s22 = scalar_lea.vmem %s871_s0, %s770_s18  ;;  %s523_s23 = sshll.u32 %s885_s10, 3 }
  0x14   : > { %s521_s24 = sshll.u32 %s209_s19, 4  ;;  %s779_s27 = scalar_lea.vmem %s873_s2, %s523_s23 }
  0x15   : > { %p215_p8 = scmp.lt.s32.totalorder %s521_s24, 46  ;;  %235 = sbr.rel (%p524_p9) target bundleno = 28 (0x1c), region = 32  ;;  %237 = vst.msk [vmem:[%s779_s27] sm:$0xff] (!%p524_p9), %vm236_vm0, %v717_v0 }
  0x17   : > { %s887_s24 = smov (!%p215_p8, %s521_s24), 46 }
  0x18   : > { %s522_s28 = sshll.u32 %s887_s24, 3 }
  0x19   : > { %s784_s3 = scalar_lea.vmem %s872_s1, %s522_s28 }
  0x1c PF: > { %s526_s4 = sshll.u32 %s200_s17, 7  ;;  %v241_v1 = vlaneseq  ;;  %v718_v2 = vmov 0.0|0.0   ;;  %v291_v5 = vld [vmem:[%s784_s3] sm:$0xff]  ;;  %v292_v6 = vld [vmem:[%s784_s3 + $0x8] sm:$0xff]  ;;  %vm719_vm1 = vmmov 0   ;;  %v720_v7 = vmov 0.0  }
  0x1d   : > { %600 = vmatprep.subr.bf16.mxu0 %v718_v2  ;;  %v789_v3 = vstv %s526_s4  ;;  %597 = vmatprep.mubr.msk.f32.mxu0 %vm719_vm1, %v720_v7  ;;  %v601_v12 = vpack.c.bf16 %v292_v6, %v291_v5  ;;  %v293_v18 = vld [vmem:[%s784_s3 + $0x10] sm:$0xff]  ;;  %v294_v19 = vld [vmem:[%s784_s3 + $0x18] sm:$0xff]  ;;  %v295_v25 = vld [vmem:[%s784_s3 + $0x20] sm:$0xff]  ;;  %v721_v62 = vmov 1.0  }
  0x1e   : > { %v791_v4 = vshrl.u32 %v241_v1, 7  ;;  %v605_v24 = vpack.c.bf16 %v294_v19, %v293_v18  ;;  %v296_v26 = vld [vmem:[%s784_s3 + $0x28] sm:$0xff]  ;;  %v297_v32 = vld [vmem:[%s784_s3 + $0x30] sm:$0xff]  ;;  %v298_v33 = vld [vmem:[%s784_s3 + $0x38] sm:$0xff] }
  0x1f   : > { %v609_v31 = vpack.c.bf16 %v296_v26, %v295_v25  ;;  %v613_v38 = vpack.c.bf16 %v298_v33, %v297_v32  ;;  %v299_v39 = vld [vmem:[%s784_s3 + $0x40] sm:$0xff]  ;;  %v300_v40 = vld [vmem:[%s784_s3 + $0x48] sm:$0xff]  ;;  %v301_v46 = vld [vmem:[%s784_s3 + $0x50] sm:$0xff] }
  0x20   : > { %v243_v8 = vadd.s32 8, %v791_v4  ;;  %v259_v9 = vadd.s32 %v789_v3, %v791_v4  ;;  %v244_v10 = vadd.s32 16, %v791_v4  ;;  %v245_v11 = vadd.s32 24, %v791_v4  ;;  %v302_v47 = vld [vmem:[%s784_s3 + $0x58] sm:$0xff]  ;;  %v303_v53 = vld [vmem:[%s784_s3 + $0x60] sm:$0xff]  ;;  %v304_v54 = vld [vmem:[%s784_s3 + $0x68] sm:$0xff] }
  0x21   : > { %v246_v13 = vadd.s32 32, %v791_v4  ;;  %v247_v14 = vadd.s32 40, %v791_v4  ;;  %v248_v21 = vadd.s32 48, %v791_v4  ;;  %v249_v22 = vadd.s32 56, %v791_v4  ;;  %v305_v58 = vld [vmem:[%s784_s3 + $0x70] sm:$0xff]  ;;  %v306_v59 = vld [vmem:[%s784_s3 + $0x78] sm:$0xff] }
  0x22   : > { %v260_v15 = vadd.s32 %v789_v3, %v243_v8  ;;  %vm275_vm2 = vcmp.lt.s32.totalorder %v259_v9, 370  ;;  %v261_v16 = vadd.s32 %v789_v3, %v244_v10  ;;  %v262_v17 = vadd.s32 %v789_v3, %v245_v11  ;;  %v527_v61 = vld [vmem:[%s203_s22] ss:$0 sm:$0xff] }
  0x23   : > { %v263_v20 = vadd.s32 %v789_v3, %v246_v13  ;;  %v264_v23 = vadd.s32 %v789_v3, %v247_v14  ;;  %v265_v27 = vadd.s32 %v789_v3, %v248_v21  ;;  %v266_v28 = vadd.s32 %v789_v3, %v249_v22  ;;  %v363_v63 = vld [vmem:[%s779_s27] sm:$0xff] }
  0x24   : > { %vm276_vm3 = vcmp.lt.s32.totalorder %v260_v15, 370  ;;  %vm277_vm4 = vcmp.lt.s32.totalorder %v261_v16, 370  ;;  %vm278_vm5 = vcmp.lt.s32.totalorder %v262_v17, 370  ;;  %v250_v29 = vadd.s32 64, %v791_v4 }
  0x25   : > { %vm602_vm6 = vmpackc.low %vm276_vm3, %vm275_vm2  ;;  %vm279_vm8 = vcmp.lt.s32.totalorder %v263_v20, 370  ;;  %vm280_vm9 = vcmp.lt.s32.totalorder %v264_v23, 370  ;;  %v251_v30 = vadd.s32 72, %v791_v4  ;;  %vm281_vm11 = vcmp.lt.s32.totalorder %v265_v27, 370 }
  0x26   : > { %603 = vmatpush3.bf16.msk.msra.mxu0 %vm602_vm6, %v601_v12  ;;  %vm606_vm7 = vmpackc.low %vm278_vm5, %vm277_vm4  ;;  %vm282_vm12 = vcmp.lt.s32.totalorder %v266_v28, 370  ;;  %v267_v34 = vadd.s32 %v789_v3, %v250_v29  ;;  %v252_v36 = vadd.s32 80, %v791_v4  ;;  %v253_v37 = vadd.s32 88, %v791_v4 }
  0x27   : > { %604 = vmatprep.subr.bf16.mxu0 %v718_v2  ;;  %vm610_vm10 = vmpackc.low %vm280_vm9, %vm279_vm8  ;;  %v268_v35 = vadd.s32 %v789_v3, %v251_v30  ;;  %v254_v41 = vadd.s32 96, %v791_v4  ;;  %v255_v42 = vadd.s32 104, %v791_v4  ;;  %v617_v45 = vpack.c.bf16 %v300_v40, %v299_v39 }
  0x28   : > { %vm614_vm13 = vmpackc.low %vm282_vm12, %vm281_vm11  ;;  %vm283_vm14 = vcmp.lt.s32.totalorder %v267_v34, 370  ;;  %v269_v43 = vadd.s32 %v789_v3, %v252_v36  ;;  %v270_v44 = vadd.s32 %v789_v3, %v253_v37  ;;  %v256_v50 = vadd.s32 112, %v791_v4 }
  0x29   : > { %vm284_vm15 = vcmp.lt.s32.totalorder %v268_v35, 370  ;;  %v271_v48 = vadd.s32 %v789_v3, %v254_v41  ;;  %v272_v49 = vadd.s32 %v789_v3, %v255_v42  ;;  %v257_v51 = vadd.s32 120, %v791_v4 }
  0x2a   : > { %607 = vmatpush3.bf16.msk.msra.mxu0 %vm606_vm7, %v605_v24  ;;  %vm618_vm0 = vmpackc.low %vm284_vm15, %vm283_vm14  ;;  %vm285_vm1 = vcmp.lt.s32.totalorder %v269_v43, 370  ;;  %vm286_vm2 = vcmp.lt.s32.totalorder %v270_v44, 370  ;;  %v621_v52 = vpack.c.bf16 %v302_v47, %v301_v46  ;;  %v273_v55 = vadd.s32 %v789_v3, %v256_v50 }
  0x2b   : > { %608 = vmatprep.subr.bf16.mxu0 %v718_v2  ;;  %vm622_vm3 = vmpackc.low %vm286_vm2, %vm285_vm1  ;;  %vm287_vm4 = vcmp.lt.s32.totalorder %v271_v48, 370  ;;  %vm288_vm5 = vcmp.lt.s32.totalorder %v272_v49, 370  ;;  %v274_v56 = vadd.s32 %v789_v3, %v257_v51  ;;  %v625_v57 = vpack.c.bf16 %v304_v54, %v303_v53 }
  0x2c   : > { %vm626_vm6 = vmpackc.low %vm288_vm5, %vm287_vm4  ;;  %vm289_vm7 = vcmp.lt.s32.totalorder %v273_v55, 370  ;;  %v629_v60 = vpack.c.bf16 %v306_v59, %v305_v58  ;;  %vm435_vm11 = vcmask 130048  }
  0x2d   : > { %vm290_vm8 = vcmp.lt.s32.totalorder %v274_v56, 370 }
  0x2e   : > { %611 = vmatpush3.bf16.msk.msra.mxu0 %vm610_vm10, %v609_v31  ;;  %vm630_vm9 = vmpackc.low %vm290_vm8, %vm289_vm7  ;;  %vm360_vm10 = vcmp.eq.s32.totalorder %v791_v4, %v527_v61 }
  0x2f   : > { %612 = vmatprep.subr.bf16.mxu0 %v718_v2 }
  0x32   : > { %615 = vmatpush3.bf16.msk.msra.mxu0 %vm614_vm13, %v613_v38 }
  0x33   : > { %616 = vmatprep.subr.bf16.mxu0 %v718_v2 }
  0x36   : > { %619 = vmatpush3.bf16.msk.msra.mxu0 %vm618_vm0, %v617_v45 }
  0x37   : > { %620 = vmatprep.subr.bf16.mxu0 %v718_v2 }
  0x3a   : > { %623 = vmatpush3.bf16.msk.msra.mxu0 %vm622_vm3, %v621_v52 }
  0x3b   : > { %624 = vmatprep.subr.bf16.mxu0 %v718_v2 }
  0x3e   : > { %627 = vmatpush3.bf16.msk.msra.mxu0 %vm626_vm6, %v625_v57 }
  0x3f   : > { %628 = vmatprep.subr.bf16.mxu0 %v718_v2 }
  0x42   : > { %631 = vmatpush3.bf16.msk.msra.mxu0 %vm630_vm9, %v629_v60 }
  0x45   : > { %598 = vmatmul.mubr.msk.f32.vlgmr.msra.gmra.mrb[0].mxu0 %vm360_vm10, %v721_v62 }
 0x118   : > { %v430_v0 = vpop.f32.mrb[0].mxu0 }
 0x119   : > { %v434_v1 = vadd.f32 %v430_v0, %v363_v63  ;;  %v599_v3 = vpop.f32.mrb[1].mxu0 }
 0x11b   : > { %436 = vst.msk [vmem:[%s779_s27] sm:$0xff] %vm435_vm11, %v434_v1 }
 0x11c PF: > { %s12_s13 = sadd.s32 1, %s715_s13   ;;  %s874_s9 = smov %s707_s11 }
 0x11d   : > { %p9_p10 = scmp.ge.s32.totalorder %s12_s13, 6   ;;  %s875_s10 = smov %s711_s12 }
 0x11e   : > { %s876_s11 = smov %s879_s14  ;;  %s877_s12 = smov %s883_s15 }
 0x11f   :  { %11 = sbr.rel (!%p9_p10) target bundleno = 3 (0x3), region = 65 }

// kernel: feature_extractor.3
= control target key start
LH: loop header
LB: loop body
LE: loop exit
PB: predicated region body
PF: predicated region fallthrough
CT: control target
= control target key end

     0   :  { %v304_v0 = vmov 0   ;;  %v305_v2 = vmov 0.0|0.0   ;;  %vm306_vm0 = vmmov 0   ;;  %v307_v6 = vmov 0.0   ;;  %s407_s1 = inlined_call_operand.vmem [shape: f32[8,1], index: 1, kind: input, shape index: {}]   ;;  %s408_s2 = inlined_call_operand.vmem [shape: f32[16,128], index: 2, kind: input, shape index: {}]   ;;  %s409_s4 = inlined_call_operand.vmem [shape: f32[128,128], index: 4, kind: input, shape index: {}]   ;;  %s410_s0 = inlined_call_operand.vmem [shape: f32[2,8,16], index: 0, kind: input, shape index: {}]   ;;  %s411_s3 = inlined_call_operand.vmem [shape: f32[1,128], index: 3, kind: input, shape index: {}]   ;;  %s412_s5 = inlined_call_operand.vmem [shape: f32[8,128], index: 5, kind: output, shape index: {}]  }
   0x1   :  { %303 = vset.pattern.permute.xlu0 %v304_v0  ;;  %v24_v1 = vld [vmem:[%s407_s1] sm:$0xff]  ;;  %272 = vmatprep.subr.bf16.mxu0 %v305_v2  ;;  %v32_v4 = vld [vmem:[%s408_s2 + $0x8] sm:$0xff]  ;;  %v117_v9 = vld [vmem:[%s409_s4 + $0x10] sm:$0xff]  ;;  %vm40_vm1 = vcmask 130048  }
   0x2   :  { %v31_v3 = vld [vmem:[%s408_s2] sm:$0xff]  ;;  %27 = vperm.xlu0 %303, %v24_v1   ;;  %275 = vmatprep.subr.bf16.mxu1 %v305_v2  ;;  %v116_v8 = vld [vmem:[%s409_s4 + $0x8] sm:$0xff]  ;;  %v118_v11 = vld [vmem:[%s409_s4 + $0x18] sm:$0xff] }
   0x3   :  { %v273_v5 = vpack.c.bf16 %v32_v4, %v31_v3  ;;  %234 = vmatprep.mubr.msk.f32.mxu0 %vm306_vm0, %v307_v6  ;;  %269 = vmatprep.mubr.msk.f32.mxu1 %vm306_vm0, %v307_v6  ;;  %v115_v7 = vld [vmem:[%s409_s4] sm:$0xff]  ;;  %v279_v12 = vpack.c.bf16 %v118_v11, %v117_v9  ;;  %v120_v14 = vld [vmem:[%s409_s4 + $0x28] sm:$0xff]  ;;  %v121_v16 = vld [vmem:[%s409_s4 + $0x30] sm:$0xff] }
   0x4   :  { %v276_v10 = vpack.c.bf16 %v116_v8, %v115_v7  ;;  %v119_v13 = vld [vmem:[%s409_s4 + $0x20] sm:$0xff]  ;;  %v122_v17 = vld [vmem:[%s409_s4 + $0x38] sm:$0xff]  ;;  %v124_v20 = vld [vmem:[%s409_s4 + $0x48] sm:$0xff] }
   0x5   :  { %274 = vmatpush3.bf16.msra.mxu0 %v273_v5  ;;  %v282_v15 = vpack.c.bf16 %v120_v14, %v119_v13  ;;  %v285_v18 = vpack.c.bf16 %v122_v17, %v121_v16  ;;  %v123_v19 = vld [vmem:[%s409_s4 + $0x40] sm:$0xff]  ;;  %v125_v22 = vld [vmem:[%s409_s4 + $0x50] sm:$0xff]  ;;  %v126_v23 = vld [vmem:[%s409_s4 + $0x58] sm:$0xff] }
   0x6   :  { %277 = vmatpush3.bf16.msra.mxu1 %v276_v10  ;;  %v288_v21 = vpack.c.bf16 %v124_v20, %v123_v19  ;;  %v291_v24 = vpack.c.bf16 %v126_v23, %v125_v22  ;;  %v127_v25 = vld [vmem:[%s409_s4 + $0x60] sm:$0xff]  ;;  %v128_v26 = vld [vmem:[%s409_s4 + $0x68] sm:$0xff]  ;;  %v129_v33 = vld [vmem:[%s409_s4 + $0x70] sm:$0xff] }
   0x7   :  { %278 = vmatprep.subr.bf16.mxu1 %v305_v2  ;;  %v294_v27 = vpack.c.bf16 %v128_v26, %v127_v25  ;;  %v20_v28 = vld [vmem:[%s410_s0] sm:$0xff]  ;;  %v207_v29 = vld [vmem:[%s410_s0 + $0x8] sm:$0xff]  ;;  %v130_v34 = vld [vmem:[%s409_s4 + $0x78] sm:$0xff] }
   0x8   :  { %v23_v30 = vadd.f32 %v207_v29, %v20_v28  ;;  %v297_v35 = vpack.c.bf16 %v130_v34, %v129_v33  ;;  %v208_v36 = vld [vmem:[%s411_s3] ss:$0 sm:$0xff] }
   0xa   :  { %280 = vmatpush3.bf16.msra.mxu1 %v279_v12 }
   0xb   :  { %281 = vmatprep.subr.bf16.mxu1 %v305_v2 }
   0xe   :  { %283 = vmatpush3.bf16.msra.mxu1 %v282_v15 }
   0xf   :  { %284 = vmatprep.subr.bf16.mxu1 %v305_v2 }
  0x12   :  { %286 = vmatpush3.bf16.msra.mxu1 %v285_v18 }
  0x13   :  { %287 = vmatprep.subr.bf16.mxu1 %v305_v2 }
  0x16   :  { %289 = vmatpush3.bf16.msra.mxu1 %v288_v21 }
  0x17   :  { %290 = vmatprep.subr.bf16.mxu1 %v305_v2 }
  0x1a   :  { %292 = vmatpush3.bf16.msra.mxu1 %v291_v24 }
  0x1b   :  { %293 = vmatprep.subr.bf16.mxu1 %v305_v2 }
  0x1e   :  { %295 = vmatpush3.bf16.msra.mxu1 %v294_v27 }
  0x1f   :  { %296 = vmatprep.subr.bf16.mxu1 %v305_v2 }
  0x22   :  { %298 = vmatpush3.bf16.msra.mxu1 %v297_v35 }
  0x81   :  { %v28_v31 = vpop.permute.xlu0 %27 }
  0x82   :  { %v30_v32 = vmul.f32 %v28_v31, %v23_v30 }
  0x84   :  { %235 = vmatmul.mubr.msk.f32.vlgmr.msra.gmra.mrb[0].mxu0 %vm40_vm1, %v30_v32 }
 0x157   :  { %v110_v37 = vpop.f32.mrb[0].mxu0 }
 0x158   :  { %v111_v38 = vadd.f32 %v208_v36, %v110_v37  ;;  %v236_v39 = vpop.f32.mrb[1].mxu0 }
 0x15a   :  { %v114_v40 = vmax.f32 %v111_v38, 0.0 }
 0x15c   :  { %270 = vmatmul.mubr.f32.vlgmr.msra.gmra.mrb[0].mxu1 %v114_v40 }
 0x22f   :  { %v197_v41 = vpop.f32.mrb[0].mxu1 }
 0x230   :  { %v201_v42 = vadd.f32 %v197_v41, %v111_v38  ;;  %v271_v43 = vpop.f32.mrb[1].mxu1 }
 0x232   :  { %202 = vst [vmem:[%s412_s5] sm:$0xff] %v201_v42 }

</bundles_post_ra>
